<compile_context>
chip_gen: v6e
topology: v6e:2x2x1
jax: 0.10.0
libtpu: 0.0.40
codegen_flags: <defaults>
</compile_context>

<pallas_src>
import jax
import jax.numpy as jnp
from jax.experimental import pallas as pl
from jax.experimental.pallas import tpu as pltpu

LANE = 128


def _round_up(n, m):
    return ((n + m - 1) // m) * m


def _mlp_kernel(x_ref, w0_ref, b0_ref, w1_ref, b1_ref, w2_ref, b2_ref, o_ref):
    # x tile: (TB, dim_x) bf16; weights bf16 (lane-padded); biases f32.
    # Layer 0: xlayer = nn.Linear(dim_x, h1)
    h = jnp.dot(x_ref[...], w0_ref[...], preferred_element_type=jnp.float32)
    h = jnp.maximum(h + b0_ref[...], 0.0)          # bias + ReLU in f32
    # self.layers: ReLU -> Linear(h1, h2) -> ReLU -> Linear(h2, dim_out)
    h = jnp.dot(h.astype(w1_ref.dtype), w1_ref[...],
                preferred_element_type=jnp.float32)
    h = jnp.maximum(h + b1_ref[...], 0.0)
    y = jnp.dot(h.astype(w2_ref.dtype), w2_ref[...],
                preferred_element_type=jnp.float32)
    o_ref[...] = (y + b2_ref[...]).astype(o_ref.dtype)


def dnnx_forward(_t, x, params, *, tb=512, compute_dtype=jnp.bfloat16):
    """Pallas implementation of DNNx.forward(_t, x).

    x: (batch, dim_x) float32
    params: dict with W0 (dim_x, h1), b0 (1, h1), W1 (h1, h2), b1 (1, h2),
            W2 (h2, dim_out), b2 (1, dim_out)   (all float32)
    """
    del _t  # unused, matches the PyTorch module
    batch, dim_x = x.shape
    h1 = params["W0"].shape[1]
    h2 = params["W1"].shape[1]
    dim_out = params["W2"].shape[1]

    # ---- zero-pad feature dims to the 128-lane width; cast weights to bf16.
    def pad_to(a, rows, cols):
        r, c = a.shape
        return jnp.pad(a, ((0, rows - r), (0, cols - c)))

    h1p, h2p, dout_p = (_round_up(d, LANE) for d in (h1, h2, dim_out))

    w0 = pad_to(params["W0"], dim_x, h1p).astype(compute_dtype)
    w1 = pad_to(params["W1"], h1p, h2p).astype(compute_dtype)
    w2 = pad_to(params["W2"], h2p, dout_p).astype(compute_dtype)
    b0 = pad_to(params["b0"], 1, h1p).astype(jnp.float32)
    b1 = pad_to(params["b1"], 1, h2p).astype(jnp.float32)
    b2 = pad_to(params["b2"], 1, dout_p).astype(jnp.float32)

    # ---- batch tiling: TB multiple of 8 (f32 sublane); pad tail rows with 0.
    tb_eff = min(tb, _round_up(batch, 8))
    padded_batch = _round_up(batch, tb_eff)
    xp = x.astype(compute_dtype)
    if padded_batch != batch:
        xp = jnp.pad(xp, ((0, padded_batch - batch), (0, 0)))
    nb = padded_batch // tb_eff

    resident = lambda shape: pl.BlockSpec(shape, lambda i: (0, 0))

    out_padded = pl.pallas_call(
        _mlp_kernel,
        out_shape=jax.ShapeDtypeStruct((padded_batch, dout_p), jnp.float32),
        grid_spec=pltpu.PrefetchScalarGridSpec(
            num_scalar_prefetch=0,
            grid=(nb,),
            in_specs=[
                pl.BlockSpec((tb_eff, dim_x), lambda i: (i, 0)),  # streamed x tile
                resident(w0.shape), resident(b0.shape),           # weights stay in VMEM
                resident(w1.shape), resident(b1.shape),
                resident(w2.shape), resident(b2.shape),
            ],
            out_specs=pl.BlockSpec((tb_eff, dout_p), lambda i: (i, 0)),
        ),
        compiler_params=pltpu.CompilerParams(
            dimension_semantics=("parallel",),     # megacore-shardable batch axis
            vmem_limit_bytes=32 * 1024 * 1024,     # explicit; safe on v5e/v6e/v7x
        ),
    )(xp, w0, b0, w1, b1, w2, b2)

    # Strip the batch-tail and lane padding outside the kernel (lane-dense store
    # inside, cheap slice outside).
    return out_padded[:batch, :dim_out]


def init_params(key, xdims):
    """Deterministic init mimicking nn.Linear defaults (U[-1/sqrt(fan_in), ...]).

    Weights are stored as (in, out) = W.T relative to PyTorch's (out, in).
    """
    dims = list(xdims)
    params = {}
    layer_dims = [(dims[0], dims[1]), (dims[1], dims[2]), (dims[2], dims[3])]
    for idx, (fan_in, fan_out) in enumerate(layer_dims):
        key, kw, kb = jax.random.split(key, 3)
        bound = 1.0 / (fan_in ** 0.5)
        params[f"W{idx}"] = jax.random.uniform(
            kw, (fan_in, fan_out), jnp.float32, -bound, bound)
        params[f"b{idx}"] = jax.random.uniform(
            kb, (1, fan_out), jnp.float32, -bound, bound)
    return params


def dnnx_reference_bf16(_t, x, params):
    """Pure-JAX reference using the same bf16-input / f32-accumulate recipe."""
    cd = jnp.bfloat16
    h = jnp.dot(x.astype(cd), params["W0"].astype(cd),
                preferred_element_type=jnp.float32) + params["b0"]
    h = jnp.maximum(h, 0.0)
    h = jnp.dot(h.astype(cd), params["W1"].astype(cd),
                preferred_element_type=jnp.float32) + params["b1"]
    h = jnp.maximum(h, 0.0)
    return jnp.dot(h.astype(cd), params["W2"].astype(cd),
                   preferred_element_type=jnp.float32) + params["b2"]


def dnnx_reference_f32(_t, x, params):
    """Full-precision reference (loose sanity check for the bf16 kernel)."""
    h = jnp.maximum(x @ params["W0"] + params["b0"], 0.0)
    h = jnp.maximum(h @ params["W1"] + params["b1"], 0.0)
    return h @ params["W2"] + params["b2"]


if __name__ == "__main__":
    # xdims = [dim_x, hidden1, hidden2, dim_out]  (num_hidden = 2)
    xdims = (4, 32, 32, 3)
    batch = 200   # deliberately NOT a multiple of the tile -> exercises tail padding
    tb = 64       # small tile for the test; grid = (4,). Use 512-2048 at real sizes.

    key = jax.random.PRNGKey(0)
    key, kx = jax.random.split(key)
    x = jax.random.normal(kx, (batch, xdims[0]), jnp.float32)
    t = jnp.zeros((batch, 1), jnp.float32)  # ignored by the module

    params = init_params(jax.random.PRNGKey(0), xdims)

    y = jax.block_until_ready(dnnx_forward(t, x, params, tb=tb))
    assert y.shape == (batch, xdims[-1])

    y_ref_bf16 = dnnx_reference_bf16(t, x, params)
    y_ref_f32 = dnnx_reference_f32(t, x, params)
    assert jnp.allclose(y, y_ref_bf16, atol=1e-4, rtol=1e-4), "mismatch vs bf16 ref"
    assert jnp.allclose(y, y_ref_f32, atol=1e-1, rtol=1e-1), "mismatch vs f32 ref"

    print("KERNEL_OK")
</pallas_src>

<mosaic_0001>
module attributes {stable_mosaic.version = 11 : i64} {
  func.func @_mlp_kernel(%arg0: i32, %arg1: memref<64x4xbf16, #tpu.memory_space<vmem>>, %arg2: memref<4x128xbf16, #tpu.memory_space<vmem>>, %arg3: memref<1x128xf32, #tpu.memory_space<vmem>>, %arg4: memref<128x128xbf16, #tpu.memory_space<vmem>>, %arg5: memref<1x128xf32, #tpu.memory_space<vmem>>, %arg6: memref<128x128xbf16, #tpu.memory_space<vmem>>, %arg7: memref<1x128xf32, #tpu.memory_space<vmem>>, %arg8: memref<64x128xf32, #tpu.memory_space<vmem>>) attributes {dimension_semantics = [#tpu.dimension_semantics<parallel>], iteration_bounds = array<i64: 4>, scalar_prefetch = 0 : i64, scratch_operands = 0 : i64, tpu.core_type = #tpu.core_type<tc>, window_params = [{transform_indices = @transform_0, window_bounds = array<i64: 64, 4>}, {pipeline_mode = #tpu.pipeline_mode<synchronous>, transform_indices = @transform_1, window_bounds = array<i64: 4, 128>}, {pipeline_mode = #tpu.pipeline_mode<synchronous>, transform_indices = @transform_2, window_bounds = array<i64: 1, 128>}, {pipeline_mode = #tpu.pipeline_mode<synchronous>, transform_indices = @transform_3, window_bounds = array<i64: 128, 128>}, {pipeline_mode = #tpu.pipeline_mode<synchronous>, transform_indices = @transform_4, window_bounds = array<i64: 1, 128>}, {pipeline_mode = #tpu.pipeline_mode<synchronous>, transform_indices = @transform_5, window_bounds = array<i64: 128, 128>}, {pipeline_mode = #tpu.pipeline_mode<synchronous>, transform_indices = @transform_6, window_bounds = array<i64: 1, 128>}, {transform_indices = @transform_7, window_bounds = array<i64: 64, 128>}]} {
    %c0 = arith.constant 0 : index
    %c0_0 = arith.constant 0 : index
    %0 = vector.load %arg1[%c0, %c0_0] : memref<64x4xbf16, #tpu.memory_space<vmem>>, vector<64x4xbf16>
    %c0_1 = arith.constant 0 : index
    %c0_2 = arith.constant 0 : index
    %1 = vector.load %arg2[%c0_1, %c0_2] : memref<4x128xbf16, #tpu.memory_space<vmem>>, vector<4x128xbf16>
    %cst = arith.constant dense<0.000000e+00> : vector<64x128xf32>
    %2 = tpu.matmul %0, %1, %cst {dimension_numbers = #tpu.dot_dimension_numbers<[1], [0], [0], [1], [0, 0, 1, 1], [], []>} : vector<64x4xbf16>, vector<4x128xbf16>, vector<64x128xf32> -> vector<64x128xf32>
    %c0_3 = arith.constant 0 : index
    %c0_4 = arith.constant 0 : index
    %3 = vector.load %arg3[%c0_3, %c0_4] : memref<1x128xf32, #tpu.memory_space<vmem>>, vector<1x128xf32>
    %4 = vector.broadcast %3 : vector<1x128xf32> to vector<64x128xf32>
    %5 = arith.addf %2, %4 : vector<64x128xf32>
    %cst_5 = arith.constant 0.000000e+00 : f32
    %6 = vector.broadcast %cst_5 : f32 to vector<64x128xf32>
    %7 = arith.maximumf %5, %6 : vector<64x128xf32>
    %8 = arith.truncf %7 : vector<64x128xf32> to vector<64x128xbf16>
    %c0_6 = arith.constant 0 : index
    %c0_7 = arith.constant 0 : index
    %9 = vector.load %arg4[%c0_6, %c0_7] : memref<128x128xbf16, #tpu.memory_space<vmem>>, vector<128x128xbf16>
    %cst_8 = arith.constant dense<0.000000e+00> : vector<64x128xf32>
    %10 = tpu.matmul %8, %9, %cst_8 {dimension_numbers = #tpu.dot_dimension_numbers<[1], [0], [0], [1], [0, 0, 1, 1], [], []>} : vector<64x128xbf16>, vector<128x128xbf16>, vector<64x128xf32> -> vector<64x128xf32>
    %c0_9 = arith.constant 0 : index
    %c0_10 = arith.constant 0 : index
    %11 = vector.load %arg5[%c0_9, %c0_10] : memref<1x128xf32, #tpu.memory_space<vmem>>, vector<1x128xf32>
    %12 = vector.broadcast %11 : vector<1x128xf32> to vector<64x128xf32>
    %13 = arith.addf %10, %12 : vector<64x128xf32>
    %cst_11 = arith.constant 0.000000e+00 : f32
    %14 = vector.broadcast %cst_11 : f32 to vector<64x128xf32>
    %15 = arith.maximumf %13, %14 : vector<64x128xf32>
    %16 = arith.truncf %15 : vector<64x128xf32> to vector<64x128xbf16>
    %c0_12 = arith.constant 0 : index
    %c0_13 = arith.constant 0 : index
    %17 = vector.load %arg6[%c0_12, %c0_13] : memref<128x128xbf16, #tpu.memory_space<vmem>>, vector<128x128xbf16>
    %cst_14 = arith.constant dense<0.000000e+00> : vector<64x128xf32>
    %18 = tpu.matmul %16, %17, %cst_14 {dimension_numbers = #tpu.dot_dimension_numbers<[1], [0], [0], [1], [0, 0, 1, 1], [], []>} : vector<64x128xbf16>, vector<128x128xbf16>, vector<64x128xf32> -> vector<64x128xf32>
    %c0_15 = arith.constant 0 : index
    %c0_16 = arith.constant 0 : index
    %19 = vector.load %arg7[%c0_15, %c0_16] : memref<1x128xf32, #tpu.memory_space<vmem>>, vector<1x128xf32>
    %20 = vector.broadcast %19 : vector<1x128xf32> to vector<64x128xf32>
    %21 = arith.addf %18, %20 : vector<64x128xf32>
    %c0_17 = arith.constant 0 : index
    %c0_18 = arith.constant 0 : index
    %22 = vector.load %arg8[%c0_17, %c0_18] : memref<64x128xf32, #tpu.memory_space<vmem>>, vector<64x128xf32>
    tpu.vector_store %arg8[%c0_17, %c0_18], %21 {strides = array<i32>} : memref<64x128xf32, #tpu.memory_space<vmem>>, vector<64x128xf32>,
    return
  }
  func.func @transform_0(%arg0: i32) -> (i32, i32) {
    %c0_i32 = arith.constant 0 : i32
    %c0_i32_0 = arith.constant 0 : i32
    return %arg0, %c0_i32 : i32, i32
  }
  func.func @transform_1(%arg0: i32) -> (i32, i32) {
    %c0_i32 = arith.constant 0 : i32
    %c0_i32_0 = arith.constant 0 : i32
    %c0_i32_1 = arith.constant 0 : i32
    return %c0_i32, %c0_i32_0 : i32, i32
  }
  func.func @transform_2(%arg0: i32) -> (i32, i32) {
    %c0_i32 = arith.constant 0 : i32
    %c0_i32_0 = arith.constant 0 : i32
    %c0_i32_1 = arith.constant 0 : i32
    return %c0_i32, %c0_i32_0 : i32, i32
  }
  func.func @transform_3(%arg0: i32) -> (i32, i32) {
    %c0_i32 = arith.constant 0 : i32
    %c0_i32_0 = arith.constant 0 : i32
    %c0_i32_1 = arith.constant 0 : i32
    return %c0_i32, %c0_i32_0 : i32, i32
  }
  func.func @transform_4(%arg0: i32) -> (i32, i32) {
    %c0_i32 = arith.constant 0 : i32
    %c0_i32_0 = arith.constant 0 : i32
    %c0_i32_1 = arith.constant 0 : i32
    return %c0_i32, %c0_i32_0 : i32, i32
  }
  func.func @transform_5(%arg0: i32) -> (i32, i32) {
    %c0_i32 = arith.constant 0 : i32
    %c0_i32_0 = arith.constant 0 : i32
    %c0_i32_1 = arith.constant 0 : i32
    return %c0_i32, %c0_i32_0 : i32, i32
  }
  func.func @transform_6(%arg0: i32) -> (i32, i32) {
    %c0_i32 = arith.constant 0 : i32
    %c0_i32_0 = arith.constant 0 : i32
    %c0_i32_1 = arith.constant 0 : i32
    return %c0_i32, %c0_i32_0 : i32, i32
  }
  func.func @transform_7(%arg0: i32) -> (i32, i32) {
    %c0_i32 = arith.constant 0 : i32
    %c0_i32_0 = arith.constant 0 : i32
    return %arg0, %c0_i32 : i32, i32
  }
}

</mosaic_0001>

<bundles_post_ra>
// kernel: tpu_custom_call.1
= control target key start
LH: loop header
LB: loop body
LE: loop exit
PB: predicated region body
PF: predicated region fallthrough
CT: control target
= control target key end

     0   :  { %12 = vsyncpa [#allocation3], 0  ;;  %s1242_s0 = inlined_call_operand.vmem [shape: bf16[256,4], index: 0, kind: input, shape index: {}]   ;;  %s1243_s1 = inlined_call_operand.vmem [shape: bf16[4,128], index: 1, kind: input, shape index: {}]   ;;  %s1244_s2 = inlined_call_operand.vmem [shape: f32[1,128], index: 2, kind: input, shape index: {}]   ;;  %s1245_s3 = inlined_call_operand.vmem [shape: bf16[128,128], index: 3, kind: input, shape index: {}]   ;;  %s1246_s4 = inlined_call_operand.vmem [shape: f32[1,128], index: 4, kind: input, shape index: {}]   ;;  %s1247_s5 = inlined_call_operand.vmem [shape: bf16[128,128], index: 5, kind: input, shape index: {}]   ;;  %s1248_s6 = inlined_call_operand.vmem [shape: f32[1,128], index: 6, kind: input, shape index: {}]   ;;  %s1249_s7 = inlined_call_operand.hbm [shape: f32[256,128], index: 7, kind: output, shape index: {}]  }
   0x1   :  { %14 = vsyncpa [#allocation3 + $0x1], 0  ;;  %s1073_s24 = smov 0   ;;  %s1075_s25 = smov 0  }
   0x2   :  { %s1077_s26 = smov 0   ;;  %s1079_s27 = smov 0  }
   0x3 LB: > { %s1094_s28 = sadd.s32 4294967295, %s1028_s27   ;;  %s779_s29 = sadd.s32 4294967294, %s1028_s27   ;;  %s1028_s27 = sphi %s1079_s27, %s1255_s27   ;;  %s1024_s26 = sphi %s1077_s26, %s1254_s26   ;;  %s1020_s25 = sphi %s1075_s25, %s1253_s25   ;;  %s1016_s24 = sphi %s1073_s24, %s1252_s24  }
   0x4   : > { %s1098_s30 = sadd.s32 1, %s1028_s27   ;;  %s179_s8 = sadd.s32 1, %s1024_s26 }
   0x5   : > { %s176_s9 = ssub.s32 %s1028_s27, %s1098_s30  ;;  %p189_p0 = scmp.ne.s32.totalorder %s1024_s26, %s1020_s25 }
   0x6   : > { %p177_p1 = scmp.eq.s32.totalorder %s176_s9, 0  ;;  %p190_p2 = scmp.eq.s32.totalorder %s1094_s28, 3 }
   0x7   : > { %p195_p3 = scmp.ne.s32.totalorder %s1020_s25, %s1016_s24  ;;  %p196_p4 = scmp.eq.s32.totalorder %s779_s29, 3 }
   0x8   : > { %s1109_s10 = scalar_select %p177_p1, %s1024_s26, %s179_s8  }
   0x9   : > { %p1111_p5 = por %p190_p2, %p189_p0  ;;  %p1115_p6 = por %p196_p4, %p195_p3 }
   0xa   : > { %p782_p7 = scmp.ge.s32.totalorder %s1028_s27, 1  ;;  %p241_p8 = scmp.lt.s32.totalorder %s1028_s27, 5 }
   0xc   : > { %p242_p9 = pnand %p782_p7, %p241_p8 }
   0xd   : > { %s784_s15 = sshll.u32 (!%p242_p9), %s1094_s28, 3  ;;  %s270_s14 = sand.u32 (!%p242_p9), 1, %s1020_s25  }
   0xe   : > { %245 = sbr.rel (%p242_p9) target bundleno = 659 (0x293), region = 48  ;;  %p274_p10 = scmp.lt.s32.totalorder (!%p242_p9), %s784_s15, 31 }
   0xf   : > { %s818_s19 = sshll.u32 (!%p242_p9), %s1094_s28, 10  ;;  %s1202_s28 = scalar_lea.sflag (!%p242_p9), [#allocation3], %s270_s14 }
  0x10   : > { %s1196_s23 = scalar_lea.hbm (!%p242_p9), %s1249_s7, %s818_s19 }
  0x13   : > { %v289_v0 = vld [vmem:[%s1243_s1] sm:$0x3]  ;;  %vm330_vm0 = vcmask 1041408   ;;  %v952_v1 = vld [vmem:[%s1245_s3 + $0x38] sm:$0xff]   ;;  %v953_v3 = vld [vmem:[%s1245_s3 + $0x30] sm:$0xff]   ;;  %s1257_s15 = smov (!%p274_p10, %s784_s15), 31 }
  0x14   : > { %906 = vmatprep.subr.msk.bf16.mxu0 %vm330_vm0, %v289_v0  ;;  %v332_v2 = vsel %vm330_vm0, %v289_v0, 0  ;;  %858 = vmatprep.subr.bf16.mxu1 %v952_v1  ;;  %v954_v4 = vld [vmem:[%s1245_s3 + $0x28] sm:$0xff]   ;;  %s785_s22 = sshll.u32 %s1257_s15, 2  ;;  %vm317_vm1 = vcmask 31744   ;;  %v955_v5 = vld [vmem:[%s1245_s3 + $0x20] sm:$0xff]   ;;  %v956_v9 = vld [vmem:[%s1245_s3 + $0x18] sm:$0xff]  }
  0x15   : > { %849 = vmatpush3.bf16.msra.mxu0 %v332_v2  ;;  %859 = vmatpush3.bf16.msra.mxu1 %v952_v1  ;;  %s277_s8 = scalar_lea.vmem %s1242_s0, %s785_s22  ;;  %v957_v11 = vld [vmem:[%s1245_s3 + $0x10] sm:$0xff]   ;;  %v958_v12 = vld [vmem:[%s1245_s3 + $0x8] sm:$0xff]   ;;  %v959_v13 = vld [vmem:[%s1245_s3] sm:$0xff]   ;;  %s783_s15 = sshll.u32 %s270_s14, 6 }
  0x16   : > { %860 = vmatprep.subr.bf16.mxu1 %v953_v3  ;;  %v948_v6 = vld [vmem:[%s277_s8] sm:$0xff]   ;;  %v949_v7 = vld [vmem:[%s277_s8 + $0x8] sm:$0xff]   ;;  %v950_v8 = vld [vmem:[%s277_s8 + $0x10] sm:$0xff]   ;;  %s272_s18 = scalar_lea.vmem [#allocation2], %s783_s15 }
  0x17   : > { %850 = vmatprep.mubr.msk.bf16.mxu0 %vm317_vm1, %v948_v6  ;;  %v951_v10 = vld [vmem:[%s277_s8 + $0x18] sm:$0xff]   ;;  %v961_v15 = vld [vmem:[%s1247_s5 + $0x30] sm:$0xff]   ;;  %v962_v16 = vld [vmem:[%s1247_s5 + $0x28] sm:$0xff]   ;;  %s717_s20 = sshll.u32 %s272_s18, 4  ;;  %s1030_s8 = smov [#allocation2]   ;;  %s1198_s20 = int_to_ptr.vmem [resolvable:$true] %s717_s20 }
  0x18   : > { %851 = vmatmul.mubr.msk.bf16.vlgmr.msra.gmra.mxu0 %vm317_vm1, %v949_v7  ;;  %v960_v14 = vld [vmem:[%s1247_s5 + $0x38] sm:$0xff]   ;;  %v963_v17 = vld [vmem:[%s1247_s5 + $0x20] sm:$0xff]   ;;  %v965_v48 = vld [vmem:[%s1247_s5 + $0x10] sm:$0xff]   ;;  %s968_s29 = scalar_lea.vmem %s1198_s20, 1024  ;;  %s972_s9 = sshll.u32 %s1030_s8, 4  ;;  %s973_s9 = int_to_ptr.vmem [resolvable:$false] %s972_s9 }
  0x19   : > { %861 = vmatpush3.bf16.msra.mxu1 %v953_v3  ;;  %854 = vmatprep.mubr.msk.bf16.mxu0 %vm317_vm1, %v950_v8  ;;  %v964_v18 = vld [vmem:[%s1247_s5 + $0x18] sm:$0xff]   ;;  %v786_v21 = vld [vmem:[%s1244_s2] ss:$0 sm:$0xff]  ;;  %v966_v49 = vld [vmem:[%s1247_s5 + $0x8] sm:$0xff]   ;;  %p969_p11 = scmp.ne.s32.totalorder %s1198_s20, %s968_s29  ;;  %s974_s13 = scalar_lea.vmem %s973_s9, 2048 }
  0x1a   : > { %862 = vmatprep.subr.bf16.mxu1 %v954_v4  ;;  %882 = vmatprep.subr.bf16.mxu0 %v960_v14  ;;  %v967_v50 = vld [vmem:[%s1247_s5] sm:$0xff]   ;;  %p975_p0 = scmp.lt.s32.totalorder %s1198_s20, %s973_s9  ;;  %p976_p1 = scmp.lt.s32.totalorder %s974_s13, %s968_s29 }
  0x1b   : > { %883 = vmatpush3.bf16.msra.mxu0 %v960_v14  ;;  %v795_v53 = vld [vmem:[%s1246_s4] ss:$0 sm:$0xff]  ;;  %p970_p12 = pnand %p969_p11, %p1111_p5 }
  0x1c   : > { %884 = vmatprep.subr.bf16.mxu0 %v961_v15  ;;  %p977_p2 = por %p976_p1, %p975_p0 }
  0x1d   : > { %863 = vmatpush3.bf16.msra.mxu1 %v954_v4  ;;  %p971_p13 = pneg %p970_p12 }
  0x1e   : > { %864 = vmatprep.subr.bf16.mxu1 %v955_v5 }
  0x1f   : > { %885 = vmatpush3.bf16.msra.mxu0 %v961_v15  ;;  %p978_p3 = pnand %p977_p2, %p971_p13 }
  0x20   : > { %855 = vmatmul.mubr.msk.bf16.gmra.mxu0 %vm317_vm1, %v951_v10  ;;  %886 = vmatprep.subr.bf16.mxu0 %v962_v16 }
  0x21   : > { %865 = vmatpush3.bf16.msra.mxu1 %v955_v5 }
  0x22   : > { %866 = vmatprep.subr.bf16.mxu1 %v956_v9 }
  0x23   : > { %887 = vmatpush3.bf16.msra.mxu0 %v962_v16  ;;  %v804_v16 = vld [vmem:[%s1248_s6] ss:$0 sm:$0xff] }
  0x24   : > { %888 = vmatprep.subr.bf16.mxu0 %v963_v17 }
  0x25   : > { %867 = vmatpush3.bf16.msra.mxu1 %v956_v9 }
  0x26   : > { %868 = vmatprep.subr.bf16.mxu1 %v957_v11 }
  0x27   : > { %889 = vmatpush3.bf16.msra.mxu0 %v963_v17 }
  0x28   : > { %890 = vmatprep.subr.bf16.mxu0 %v964_v18 }
  0x29   : > { %869 = vmatpush3.bf16.msra.mxu1 %v957_v11 }
  0x2a   : > { %870 = vmatprep.subr.bf16.mxu1 %v958_v12 }
  0x2b   : > { %891 = vmatpush3.bf16.msra.mxu0 %v964_v18 }
  0x2c   : > { %892 = vmatprep.subr.bf16.mxu0 %v965_v48 }
  0x2d   : > { %871 = vmatpush3.bf16.msra.mxu1 %v958_v12 }
  0x2e   : > { %872 = vmatprep.subr.bf16.mxu1 %v959_v13 }
  0x2f   : > { %893 = vmatpush3.bf16.msra.mxu0 %v965_v48 }
  0x30   : > { %894 = vmatprep.subr.bf16.mxu0 %v966_v49 }
  0x31   : > { %873 = vmatpush3.bf16.msra.mxu1 %v959_v13 }
  0x33   : > { %895 = vmatpush3.bf16.msra.mxu0 %v966_v49 }
  0x34   : > { %896 = vmatprep.subr.bf16.mxu0 %v967_v50 }
  0x37   : > { %897 = vmatpush3.bf16.msra.mxu0 %v967_v50 }
  0xd8   : > { %v852_v19 = vpop.f32.mrf.mxu0 }
  0xd9   : > { %v377_v25 = vadd.f32 %v852_v19, %v786_v21 }
  0xda   : > { %v368_v20 = vpop.f32.mrf.mxu0 }
  0xdb   : > { %v369_v23 = vadd.f32 %v786_v21, %v368_v20  ;;  %v401_v32 = vmax.f32 %v377_v25, 0.0 }
  0xdc   : > { %v853_v22 = vpop.f32.mrf.mxu0 }
  0xdd   : > { %v380_v24 = vadd.f32 %v853_v22, %v786_v21  ;;  %v399_v30 = vmax.f32 %v369_v23, 0.0 }
  0xde   : > { %v371_v26 = vpop.f32.mrf.mxu0 }
  0xdf   : > { %v372_v27 = vadd.f32 %v786_v21, %v371_v26  ;;  %v402_v28 = vmax.f32 %v380_v24, 0.0 }
  0xe0   : > { %v856_v29 = vpop.f32.mrf.mxu0 }
  0xe1   : > { %v400_v31 = vmax.f32 %v372_v27, 0.0  ;;  %v408_v35 = vpack.c.bf16 %v402_v28, %v401_v32  ;;  %v393_v39 = vadd.f32 %v856_v29, %v786_v21 }
  0xe2   : > { %v384_v33 = vpop.f32.mrf.mxu0 }
  0xe3   : > { %v407_v34 = vpack.c.bf16 %v400_v31, %v399_v30  ;;  %v385_v37 = vadd.f32 %v786_v21, %v384_v33  ;;  %v405_v45 = vmax.f32 %v393_v39, 0.0 }
  0xe4   : > { %v857_v36 = vpop.f32.mrf.mxu0 }
  0xe5   : > { %v396_v38 = vadd.f32 %v857_v36, %v786_v21  ;;  %874 = vmatprep.mubr.bf16.mxu1 %v407_v34  ;;  %v403_v43 = vmax.f32 %v385_v37, 0.0 }
  0xe6   : > { %v387_v40 = vpop.f32.mrf.mxu0  ;;  %875 = vmatmul.mubr.bf16.vlgmr.msra.gmra.mxu1 %v408_v35 }
  0xe7   : > { %v388_v41 = vadd.f32 %v786_v21, %v387_v40  ;;  %v406_v42 = vmax.f32 %v396_v38, 0.0 }
  0xe9   : > { %v404_v44 = vmax.f32 %v388_v41, 0.0  ;;  %v410_v47 = vpack.c.bf16 %v406_v42, %v405_v45 }
  0xeb   : > { %v409_v46 = vpack.c.bf16 %v404_v44, %v403_v43 }
  0xed   : > { %878 = vmatprep.mubr.bf16.mxu1 %v409_v46 }
  0xee   : > { %879 = vmatmul.mubr.bf16.gmra.mxu1 %v410_v47 }
 0x1a6   : > { %v876_v51 = vpop.f32.mrf.mxu1 }
 0x1a7   : > { %v525_v57 = vadd.f32 %v876_v51, %v795_v53 }
 0x1a8   : > { %v516_v52 = vpop.f32.mrf.mxu1 }
 0x1a9   : > { %v517_v55 = vadd.f32 %v795_v53, %v516_v52  ;;  %v549_v0 = vmax.f32 %v525_v57, 0.0 }
 0x1aa   : > { %v877_v54 = vpop.f32.mrf.mxu1 }
 0x1ab   : > { %v528_v56 = vadd.f32 %v877_v54, %v795_v53  ;;  %v547_v62 = vmax.f32 %v517_v55, 0.0 }
 0x1ac   : > { %v519_v58 = vpop.f32.mrf.mxu1 }
 0x1ad   : > { %v520_v59 = vadd.f32 %v795_v53, %v519_v58  ;;  %v550_v60 = vmax.f32 %v528_v56, 0.0 }
 0x1ae   : > { %v880_v61 = vpop.f32.mrf.mxu1 }
 0x1af   : > { %v548_v63 = vmax.f32 %v520_v59, 0.0  ;;  %v556_v3 = vpack.c.bf16 %v550_v60, %v549_v0  ;;  %v541_v7 = vadd.f32 %v880_v61, %v795_v53 }
 0x1b0   : > { %v532_v1 = vpop.f32.mrf.mxu1 }
 0x1b1   : > { %v555_v2 = vpack.c.bf16 %v548_v63, %v547_v62  ;;  %v533_v5 = vadd.f32 %v795_v53, %v532_v1  ;;  %v553_v13 = vmax.f32 %v541_v7, 0.0 }
 0x1b2   : > { %v881_v4 = vpop.f32.mrf.mxu1 }
 0x1b3   : > { %v544_v6 = vadd.f32 %v881_v4, %v795_v53  ;;  %898 = vmatprep.mubr.bf16.mxu0 %v555_v2  ;;  %v551_v11 = vmax.f32 %v533_v5, 0.0 }
 0x1b4   : > { %v535_v8 = vpop.f32.mrf.mxu1  ;;  %899 = vmatmul.mubr.bf16.vlgmr.msra.gmra.mxu0 %v556_v3 }
 0x1b5   : > { %v536_v9 = vadd.f32 %v795_v53, %v535_v8  ;;  %v554_v10 = vmax.f32 %v544_v6, 0.0 }
 0x1b7   : > { %v552_v12 = vmax.f32 %v536_v9, 0.0  ;;  %v558_v15 = vpack.c.bf16 %v554_v10, %v553_v13 }
 0x1b9   : > { %v557_v14 = vpack.c.bf16 %v552_v12, %v551_v11 }
 0x1bb   : > { %902 = vmatprep.mubr.bf16.mxu0 %v557_v14 }
 0x1bc   : > { %903 = vmatmul.mubr.bf16.gmra.mxu0 %v558_v15 }
 0x274   : > { %v900_v17 = vpop.f32.mrf.mxu0 }
 0x275   : > { %v673_v18 = vadd.f32 %v900_v17, %v804_v16 }
 0x276   : > { %v664_v19 = vpop.f32.mrf.mxu0 }
 0x277   : > { %697 = vst [vmem:[%s272_s18 + $0x10] sm:$0xff] %v673_v18  ;;  %v665_v20 = vadd.f32 %v804_v16, %v664_v19 }
 0x278   : > { %v901_v21 = vpop.f32.mrf.mxu0 }
 0x279   : > { %695 = vst [vmem:[%s272_s18] sm:$0xff] %v665_v20  ;;  %v676_v22 = vadd.f32 %v901_v21, %v804_v16 }
 0x27a   : > { %v667_v23 = vpop.f32.mrf.mxu0 }
 0x27b   : > { %698 = vst [vmem:[%s272_s18 + $0x18] sm:$0xff] %v676_v22  ;;  %v668_v24 = vadd.f32 %v804_v16, %v667_v23 }
 0x27c   : > { %v904_v25 = vpop.f32.mrf.mxu0 }
 0x27d   : > { %696 = vst [vmem:[%s272_s18 + $0x8] sm:$0xff] %v668_v24  ;;  %v689_v26 = vadd.f32 %v904_v25, %v804_v16 }
 0x27e   : > { %v680_v27 = vpop.f32.mrf.mxu0 }
 0x27f   : > { %701 = vst [vmem:[%s272_s18 + $0x30] sm:$0xff] %v689_v26  ;;  %v681_v28 = vadd.f32 %v804_v16, %v680_v27 }
 0x280   : > { %v905_v29 = vpop.f32.mrf.mxu0 }
 0x281   : > { %699 = vst [vmem:[%s272_s18 + $0x20] sm:$0xff] %v681_v28  ;;  %v692_v30 = vadd.f32 %v905_v29, %v804_v16 }
 0x282   : > { %v683_v31 = vpop.f32.mrf.mxu0 }
 0x283   : > { %702 = vst [vmem:[%s272_s18 + $0x38] sm:$0xff] %v692_v30  ;;  %v684_v32 = vadd.f32 %v804_v16, %v683_v31 }
 0x285   : > { %700 = vst [vmem:[%s272_s18 + $0x28] sm:$0xff] %v684_v32 }
 0x286   : > { %981 = shalt.err (!%p978_p3)
}
 0x287   : > { %s982_s14 = scalar_lea.hbm %s1196_s23, 1024  ;;  %s986_s17 = scalar_lea.hbm %s1249_s7, 4096 }
 0x288   : > { %p983_p4 = scmp.ne.s32.totalorder %s1196_s23, %s982_s14  ;;  %p987_p9 = scmp.lt.s32.totalorder %s1196_s23, %s1249_s7 }
 0x289   : > { %p988_p10 = scmp.lt.s32.totalorder %s986_s17, %s982_s14 }
 0x28a   : > { %p984_p7 = pnand %p983_p4, %p1111_p5 }
 0x28b   : > { %p989_p11 = por %p988_p10, %p987_p9 }
 0x28c   : > { %p985_p8 = pneg %p984_p7 }
 0x28e   : > { %p990_p12 = pnand %p989_p11, %p985_p8 }
 0x290   : > { %993 = shalt.err (!%p990_p12)
}
 0x291   : > { %s1031_s21 = smov 128   ;;  %s1032_s22 = smov 8  }
 0x292   : > { %907 = dma.vmem_to_hbm [thread:$0]  (%p1111_p5), %s1198_s20, 1024, %s1196_s23, %s1202_s28, %s1031_s21, %s1031_s21, %s1032_s22  }
 0x293 PF: > { %p913_p13 = scmp.ge.s32.totalorder %s1028_s27, 2  ;;  %s732_s29 = sand.u32 1, %s1016_s24  }
 0x294   : > { %s733_s8 = scalar_lea.sflag [#allocation3], %s732_s29 }
 0x295   : > { %p910_p0 = pnand %p913_p13, %p1115_p6 }
 0x297   : > { %p911_p1 = pneg %p910_p0 }
 0x299   : > { %1011 = dma.done.wait (%p911_p1), %s733_s8, 1024  }
 0x29a   : > { %1013 = vsyncadd (%p911_p1), %s733_s8, 4294966272  ;;  %p17_p2 = scmp.ge.s32.totalorder %s1098_s30, 6   ;;  %s1252_s24 = smov %s1020_s25 }
 0x29b   : > { %s1253_s25 = smov %s1024_s26  ;;  %s1254_s26 = smov %s1109_s10 }
 0x29c   : > { %s1255_s27 = smov %s1098_s30  ;;  %19 = sbr.rel (!%p17_p2) target bundleno = 3 (0x3), region = 83 }
 0x2a1   :  { %738 = vsyncpa [#allocation3], 1 }
 0x2a2   :  { %740 = vsyncpa [#allocation3 + $0x1], 1 }

</bundles_post_ra>
